<compile_context>
chip_gen: v7x
topology: tpu7x:2x2x1
jax: 0.10.0
libtpu: 0.0.40
codegen_flags: <defaults>
</compile_context>

<pallas_src>
import functools

import jax
import jax.numpy as jnp
from jax.experimental import pallas as pl
from jax.experimental.pallas import tpu as pltpu


def _mlp_kernel(x_ref, w1t_ref, b1_ref, w2t_ref, b2_ref, logits_ref, emb_ref):
    # x_ref: (TB, 10), w1t_ref: (10, 20), b1_ref: (1, 20),
    # w2t_ref: (20, 2), b2_ref: (1, 2)
    x = x_ref[...]                                                          # (TB, 10)
    h = jnp.dot(x, w1t_ref[...], preferred_element_type=jnp.float32)       # (TB, 20)
    h = jnp.maximum(h + b1_ref[...], 0.0)                                   # bias + ReLU
    emb_ref[...] = h.astype(emb_ref.dtype)                                  # row-contiguous store
    logits = jnp.dot(h, w2t_ref[...], preferred_element_type=jnp.float32)   # (TB, 2)
    logits_ref[...] = (logits + b2_ref[...]).astype(logits_ref.dtype)       # row-contiguous store


@functools.partial(jax.jit, static_argnames=("tb",))
def _forward(x, w1, b1, w2, b2, *, tb=8192):
    """Fused SimpleModel forward.

    Args:
      x:  (B, 10) float32 features.
      w1: (20, 10), b1: (20,), w2: (2, 20), b2: (2,)  (PyTorch nn.Linear layout).
      tb: batch-tile (rows per grid step); multiple of 8.  8192 is a safe
          cross-generation default; 16384-32768 is fine on v6e/v7x.
    Returns:
      dict with 'logits' (B, 2) and 'embeddings' (B, 20).
    """
    B, d_in = x.shape
    h_dim = w1.shape[0]
    o_dim = w2.shape[0]

    # (out, in) -> (in, out) so the kernel can keep x in natural orientation.
    w1_t = jnp.transpose(w1)            # (10, 20)
    w2_t = jnp.transpose(w2)            # (20, 2)
    b1_r = b1.reshape(1, h_dim)
    b2_r = b2.reshape(1, o_dim)

    if B <= tb:
        tile = B                         # single block == full array dims
    else:
        assert tb % 8 == 0, "batch tile must be a multiple of 8 when tiling"
        tile = tb
    grid = (pl.cdiv(B, tile),)           # ragged last block handled by Pallas masking

    # Each f32 block with last-dim <= 128 lane-pads to tile*512 B in VMEM;
    # 3 streams (x, emb, logits) x 2 pipeline buffers, plus ~50% headroom.
    vmem_limit = int(min(max(4 << 20, (3 * 3 * 2 * 512 * tile) // 2), 60 << 20))

    cost = pl.CostEstimate(
        flops=2 * B * (d_in * h_dim + h_dim * o_dim),
        transcendentals=0,
        bytes_accessed=4 * (B * (d_in + h_dim + o_dim)
                            + d_in * h_dim + h_dim + h_dim * o_dim + o_dim),
    )

    logits, embeddings = pl.pallas_call(
        _mlp_kernel,
        out_shape=(
            jax.ShapeDtypeStruct((B, o_dim), jnp.float32),    # logits
            jax.ShapeDtypeStruct((B, h_dim), jnp.float32),    # embeddings
        ),
        grid=grid,
        in_specs=[
            pl.BlockSpec((tile, d_in), lambda i: (i, 0)),     # x tile
            pl.BlockSpec((d_in, h_dim), lambda i: (0, 0)),    # W1^T (VMEM-resident)
            pl.BlockSpec((1, h_dim), lambda i: (0, 0)),       # b1   (VMEM-resident)
            pl.BlockSpec((h_dim, o_dim), lambda i: (0, 0)),   # W2^T (VMEM-resident)
            pl.BlockSpec((1, o_dim), lambda i: (0, 0)),       # b2   (VMEM-resident)
        ],
        out_specs=(
            pl.BlockSpec((tile, o_dim), lambda i: (i, 0)),
            pl.BlockSpec((tile, h_dim), lambda i: (i, 0)),
        ),
        compiler_params=pltpu.CompilerParams(
            dimension_semantics=("parallel",),
            vmem_limit_bytes=vmem_limit,
        ),
        cost_estimate=cost,
    )(x, w1_t, b1_r, w2_t, b2_r)

    return {"logits": logits, "embeddings": embeddings}


def simple_model_forward(x, w1, b1, w2, b2, *, tb=8192):
    """Mirrors SimpleModel.forward, including the dict-input convenience."""
    if isinstance(x, dict):
        x = x["features"] if "features" in x else next(iter(x.values()))
    return _forward(x, w1, b1, w2, b2, tb=tb)


def init_params(key):
    """Deterministic parameter init matching nn.Linear (out, in) shapes."""
    k1, k2, k3, k4 = jax.random.split(key, 4)
    w1 = jax.random.uniform(k1, (20, 10), jnp.float32, -0.3, 0.3)
    b1 = jax.random.uniform(k2, (20,), jnp.float32, -0.3, 0.3)
    w2 = jax.random.uniform(k3, (2, 20), jnp.float32, -0.2, 0.2)
    b2 = jax.random.uniform(k4, (2,), jnp.float32, -0.2, 0.2)
    return w1, b1, w2, b2


def _reference(x, w1, b1, w2, b2):
    h = jnp.maximum(x @ w1.T + b1, 0.0)
    logits = h @ w2.T + b2
    return logits, h


if __name__ == "__main__":
    key = jax.random.PRNGKey(0)
    kx, kp = jax.random.split(key)
    w1, b1, w2, b2 = init_params(kp)

    # Small-shape check (single block == full array dims, grid of 1).
    batch = 8
    x = jax.random.normal(kx, (batch, 10), jnp.float32)
    out = simple_model_forward(x, w1, b1, w2, b2)
    jax.block_until_ready(out)
    logits_ref, emb_ref = _reference(x, w1, b1, w2, b2)
    assert out["logits"].shape == (batch, 2)
    assert out["embeddings"].shape == (batch, 20)
    assert jnp.allclose(out["logits"], logits_ref, atol=1e-5)
    assert jnp.allclose(out["embeddings"], emb_ref, atol=1e-5)

    # Dict-input path (matches the PyTorch forward's convenience behavior).
    out_d = simple_model_forward({"features": x}, w1, b1, w2, b2)
    jax.block_until_ready(out_d)
    assert jnp.allclose(out_d["logits"], logits_ref, atol=1e-5)

    # Tiled path with a ragged boundary block (grid > 1, no padding copy).
    batch2 = 300
    x2 = jax.random.normal(jax.random.PRNGKey(1), (batch2, 10), jnp.float32)
    out2 = simple_model_forward(x2, w1, b1, w2, b2, tb=128)
    jax.block_until_ready(out2)
    logits_ref2, emb_ref2 = _reference(x2, w1, b1, w2, b2)
    assert out2["logits"].shape == (batch2, 2)
    assert out2["embeddings"].shape == (batch2, 20)
    assert jnp.allclose(out2["logits"], logits_ref2, atol=1e-5)
    assert jnp.allclose(out2["embeddings"], emb_ref2, atol=1e-5)

    print("KERNEL_OK")
</pallas_src>

<mosaic_0001>
module attributes {stable_mosaic.version = 11 : i64} {
  func.func @_mlp_kernel(%arg0: i32, %arg1: memref<8x10xf32, #tpu.memory_space<vmem>>, %arg2: memref<10x20xf32, #tpu.memory_space<vmem>>, %arg3: memref<1x20xf32, #tpu.memory_space<vmem>>, %arg4: memref<20x2xf32, #tpu.memory_space<vmem>>, %arg5: memref<1x2xf32, #tpu.memory_space<vmem>>, %arg6: memref<8x2xf32, #tpu.memory_space<vmem>>, %arg7: memref<8x20xf32, #tpu.memory_space<vmem>>) attributes {dimension_semantics = [#tpu.dimension_semantics<parallel>], iteration_bounds = array<i64: 1>, scalar_prefetch = 0 : i64, scratch_operands = 0 : i64, tpu.core_type = #tpu.core_type<tc>, window_params = [{transform_indices = @transform_0, window_bounds = array<i64: 8, 10>}, {pipeline_mode = #tpu.pipeline_mode<synchronous>, transform_indices = @transform_1, window_bounds = array<i64: 10, 20>}, {pipeline_mode = #tpu.pipeline_mode<synchronous>, transform_indices = @transform_2, window_bounds = array<i64: 1, 20>}, {pipeline_mode = #tpu.pipeline_mode<synchronous>, transform_indices = @transform_3, window_bounds = array<i64: 20, 2>}, {pipeline_mode = #tpu.pipeline_mode<synchronous>, transform_indices = @transform_4, window_bounds = array<i64: 1, 2>}, {transform_indices = @transform_5, window_bounds = array<i64: 8, 2>}, {transform_indices = @transform_6, window_bounds = array<i64: 8, 20>}]} {
    %c0 = arith.constant 0 : index
    %c0_0 = arith.constant 0 : index
    %0 = vector.load %arg1[%c0, %c0_0] : memref<8x10xf32, #tpu.memory_space<vmem>>, vector<8x10xf32>
    %c0_1 = arith.constant 0 : index
    %c0_2 = arith.constant 0 : index
    %1 = vector.load %arg2[%c0_1, %c0_2] : memref<10x20xf32, #tpu.memory_space<vmem>>, vector<10x20xf32>
    %cst = arith.constant dense<0.000000e+00> : vector<8x20xf32>
    %2 = tpu.matmul %0, %1, %cst {dimension_numbers = #tpu.dot_dimension_numbers<[1], [0], [0], [1], [0, 0, 1, 1], [], []>} : vector<8x10xf32>, vector<10x20xf32>, vector<8x20xf32> -> vector<8x20xf32>
    %c0_3 = arith.constant 0 : index
    %c0_4 = arith.constant 0 : index
    %3 = vector.load %arg3[%c0_3, %c0_4] : memref<1x20xf32, #tpu.memory_space<vmem>>, vector<1x20xf32>
    %4 = vector.broadcast %3 : vector<1x20xf32> to vector<8x20xf32>
    %5 = arith.addf %2, %4 : vector<8x20xf32>
    %cst_5 = arith.constant 0.000000e+00 : f32
    %6 = vector.broadcast %cst_5 : f32 to vector<8x20xf32>
    %7 = arith.maximumf %5, %6 : vector<8x20xf32>
    %c0_6 = arith.constant 0 : index
    %c0_7 = arith.constant 0 : index
    %8 = vector.load %arg7[%c0_6, %c0_7] : memref<8x20xf32, #tpu.memory_space<vmem>>, vector<8x20xf32>
    tpu.vector_store %arg7[%c0_6, %c0_7], %7 {strides = array<i32>} : memref<8x20xf32, #tpu.memory_space<vmem>>, vector<8x20xf32>,
    %c0_8 = arith.constant 0 : index
    %c0_9 = arith.constant 0 : index
    %9 = vector.load %arg4[%c0_8, %c0_9] : memref<20x2xf32, #tpu.memory_space<vmem>>, vector<20x2xf32>
    %cst_10 = arith.constant dense<0.000000e+00> : vector<8x2xf32>
    %10 = tpu.matmul %7, %9, %cst_10 {dimension_numbers = #tpu.dot_dimension_numbers<[1], [0], [0], [1], [0, 0, 1, 1], [], []>} : vector<8x20xf32>, vector<20x2xf32>, vector<8x2xf32> -> vector<8x2xf32>
    %c0_11 = arith.constant 0 : index
    %c0_12 = arith.constant 0 : index
    %11 = vector.load %arg5[%c0_11, %c0_12] : memref<1x2xf32, #tpu.memory_space<vmem>>, vector<1x2xf32>
    %12 = vector.broadcast %11 : vector<1x2xf32> to vector<8x2xf32>
    %13 = arith.addf %10, %12 : vector<8x2xf32>
    %c0_13 = arith.constant 0 : index
    %c0_14 = arith.constant 0 : index
    %14 = vector.load %arg6[%c0_13, %c0_14] : memref<8x2xf32, #tpu.memory_space<vmem>>, vector<8x2xf32>
    tpu.vector_store %arg6[%c0_13, %c0_14], %13 {strides = array<i32>} : memref<8x2xf32, #tpu.memory_space<vmem>>, vector<8x2xf32>,
    return
  }
  func.func @transform_0(%arg0: i32) -> (i32, i32) {
    %c0_i32 = arith.constant 0 : i32
    %c0_i32_0 = arith.constant 0 : i32
    return %arg0, %c0_i32 : i32, i32
  }
  func.func @transform_1(%arg0: i32) -> (i32, i32) {
    %c0_i32 = arith.constant 0 : i32
    %c0_i32_0 = arith.constant 0 : i32
    %c0_i32_1 = arith.constant 0 : i32
    return %c0_i32, %c0_i32_0 : i32, i32
  }
  func.func @transform_2(%arg0: i32) -> (i32, i32) {
    %c0_i32 = arith.constant 0 : i32
    %c0_i32_0 = arith.constant 0 : i32
    %c0_i32_1 = arith.constant 0 : i32
    return %c0_i32, %c0_i32_0 : i32, i32
  }
  func.func @transform_3(%arg0: i32) -> (i32, i32) {
    %c0_i32 = arith.constant 0 : i32
    %c0_i32_0 = arith.constant 0 : i32
    %c0_i32_1 = arith.constant 0 : i32
    return %c0_i32, %c0_i32_0 : i32, i32
  }
  func.func @transform_4(%arg0: i32) -> (i32, i32) {
    %c0_i32 = arith.constant 0 : i32
    %c0_i32_0 = arith.constant 0 : i32
    %c0_i32_1 = arith.constant 0 : i32
    return %c0_i32, %c0_i32_0 : i32, i32
  }
  func.func @transform_5(%arg0: i32) -> (i32, i32) {
    %c0_i32 = arith.constant 0 : i32
    %c0_i32_0 = arith.constant 0 : i32
    return %arg0, %c0_i32 : i32, i32
  }
  func.func @transform_6(%arg0: i32) -> (i32, i32) {
    %c0_i32 = arith.constant 0 : i32
    %c0_i32_0 = arith.constant 0 : i32
    return %arg0, %c0_i32 : i32, i32
  }
}

</mosaic_0001>

<bundles_post_ra>
// kernel: _forward.1
= control target key start
LH: loop header
LB: loop body
LE: loop exit
PB: predicated region body
PF: predicated region fallthrough
CT: control target
= control target key end

     0   :  { %vm37_vm0 = vcmask 1041408   ;;  %v286_v2 = vmov 0.0|0.0   ;;  %vm287_vm1 = vmmov 1   ;;  %vm288_vm3 = vmmov 0   ;;  %s365_s0 = inlined_call_operand.vmem [shape: f32[8,10], index: 0, kind: input, shape index: {}]   ;;  %s366_s1 = inlined_call_operand.vmem [shape: f32[10,20], index: 1, kind: input, shape index: {}]   ;;  %s367_s2 = inlined_call_operand.vmem [shape: f32[1,20], index: 2, kind: input, shape index: {}]   ;;  %s368_s3 = inlined_call_operand.vmem [shape: f32[20,2], index: 3, kind: input, shape index: {}]   ;;  %s369_s4 = inlined_call_operand.vmem [shape: f32[1,2], index: 4, kind: input, shape index: {}]   ;;  %s370_s5 = inlined_call_operand.vmem [shape: f32[8,2], index: 5, kind: output, shape index: {0}]   ;;  %s371_s6 = inlined_call_operand.hbm [shape: f32[8,20], index: 6, kind: output, shape index: {1}]  }
   0x1   :  { %v24_v0 = vld [vmem:[%s366_s1] sm:$0xff]  ;;  %v25_v1 = vld [vmem:[%s366_s1 + $0x8] sm:$0x3]  ;;  %250 = vmatprep.subr.bf16.mxu0 %v286_v2  ;;  %vm252_vm2 = vmpackc.low %vm37_vm0, %vm287_vm1  ;;  %254 = vmatprep.subr.bf16.mxu1 %v286_v2  ;;  %v289_v4 = vmov 0.0  }
   0x2   :  { %v251_v3 = vpack.c.bf16 %v25_v1, %v24_v0  ;;  %238 = vmatprep.mubr.msk.f32.mxu0 %vm288_vm3, %v289_v4  ;;  %247 = vmatprep.mubr.msk.f32.mxu1 %vm288_vm3, %v289_v4 }
   0x3   :  { %12 = vsyncpa [#allocation3], 0  ;;  %v23_v5 = vld [vmem:[%s365_s0] sm:$0xff]  ;;  %vm33_vm4 = vcmask 80896   ;;  %v115_v7 = vld [vmem:[%s368_s3 + $0x8] sm:$0xff]  ;;  %vm127_vm5 = vcmask 1043456  }
   0x4   :  { %253 = vmatpush3.bf16.msk.msra.mxu0 %vm252_vm2, %v251_v3  ;;  %v114_v6 = vld [vmem:[%s368_s3] sm:$0xff]  ;;  %v116_v9 = vld [vmem:[%s368_s3 + $0x10] sm:$0xf]  ;;  %vm112_vm6 = vcmask 162816   ;;  %s290_s9 = smov [#allocation2]  }
   0x5   :  { %v255_v8 = vpack.c.bf16 %v115_v7, %v114_v6  ;;  %v221_v10 = vld [vmem:[%s367_s2] ss:$0 sm:$0xff]  ;;  %s211_s10 = sshll.u32 %s290_s9, 4  ;;  %s212_s10 = int_to_ptr.vmem [resolvable:$true] %s211_s10 }
   0x6   :  { %s262_s11 = scalar_lea.vmem %s212_s10, 128  ;;  %p267_p1 = scmp.lt.s32.totalorder %s212_s10, %s212_s10 }
   0x7   :  { %239 = vmatmul.mubr.msk.f32.vlgmr.msra.gmra.mrb[0].mxu0 %vm33_vm4, %v23_v5  ;;  %256 = vmatpush3.bf16.msra.mxu1 %v255_v8  ;;  %p263_p0 = scmp.ne.s32.totalorder %s212_s10, %s262_s11  ;;  %p268_p2 = scmp.lt.s32.totalorder %s262_s11, %s262_s11 }
   0x8   :  { %245 = vmatprep.subr.mxu1 %v289_v4 }
   0x9   :  { %p269_p3 = por %p268_p2, %p267_p1 }
   0xb   :  { %246 = vmatpush3.msk.msra.mxu1 %vm127_vm5, %v116_v9  ;;  %p270_p4 = pnand %p269_p3, %p263_p0 }
  0xda   :  { %v107_v11 = vpop.f32.mrb[0].mxu0 }
  0xdb   :  { %v108_v12 = vadd.f32 %v221_v10, %v107_v11  ;;  %v240_v13 = vpop.f32.mrb[1].mxu0 }
  0xdd   :  { %v111_v14 = vmax.f32 %v108_v12, 0.0 }
  0xdf   :  { %248 = vmatmul.mubr.msk.f32.vlgmr.msra.gmra.mrb[0].mxu1 %vm112_vm6, %v111_v14  ;;  %113 = vst.msk [vmem:[#allocation2] sm:$0xff] %vm112_vm6, %v111_v14 }
  0xe0   :  { %273 = shalt.err (!%p270_p4)
}
  0xe1   :  { %s274_s2 = scalar_lea.hbm %s371_s6, 128 }
  0xe2   :  { %p275_p5 = scmp.ne.s32.totalorder %s371_s6, %s274_s2  ;;  %p278_p6 = scmp.lt.u32.totalorder %s274_s2, %s371_s6 }
  0xe4   :  { %p280_p7 = pnand %p278_p6, %p275_p5 }
  0xe6   :  { %283 = shalt.err (!%p280_p7)
}
  0xe7   :  { %214 = dma.vmem_to_hbm [thread:$0]  %s212_s10, 128, %s371_s6, [#allocation3]   ;;  %v224_v15 = vld [vmem:[%s369_s4] ss:$0 sm:$0xff]  ;;  %vm201_vm7 = vcmask 15360  }
 0x1b2   :  { %v197_v16 = vpop.f32.mrb[0].mxu1 }
 0x1b3   :  { %v198_v17 = vadd.f32 %v224_v15, %v197_v16  ;;  %v249_v18 = vpop.f32.mrb[1].mxu1 }
 0x1b5   :  { %202 = vst.msk [vmem:[%s370_s5] sm:$0xff] %vm201_vm7, %v198_v17 }
 0x1b6   :  { %284 = dma.done.wait [#allocation3], 128  }
 0x1b7   :  { %285 = vsyncadd [#allocation3], 4294967168 }
 0x1b8   :  { %220 = vsyncpa [#allocation3], 1 }

</bundles_post_ra>
